<compile_context>
chip_gen: v6e
topology: v6e:2x2x1
jax: 0.10.0
libtpu: 0.0.40
codegen_flags: <defaults>
</compile_context>

<pallas_src>
import functools

import jax
import jax.numpy as jnp
import numpy as np
from jax import lax
from jax.experimental import pallas as pl
from jax.experimental.pallas import tpu as pltpu


def _block_kernel(x_ref, wa_ref, w2_ref, w3_ref, bias_ref, out_ref, *,
                  B, H, W, Cin, Cmid, Cout, has_shortcut, add_identity):
    """Single invocation; batch stacked along sublanes: refs are (B*H, W*C)."""
    BH = B * H
    WCmid, WCout = W * Cmid, W * Cout

    x = x_ref[...]                                            # (B*H, W*Cin)

    # ---- conv1(1x1)+bn1 (+ fused shortcut conv+bn): one block-diag matmul --
    y = jnp.dot(x, wa_ref[...], preferred_element_type=jnp.float32)
    h1 = jnp.maximum(y[:, :WCmid] + bias_ref[0:1, :WCmid], 0.0)      # relu1
    if has_shortcut:
        # Consume the shortcut half of `y` right away (short live range).
        sc = y[:, WCmid:WCmid + WCout] + bias_ref[3:4, :WCout]

    # ---- conv2: 3x3 depthwise, pad=1, stride=1, in packed layout -----------
    # Edge masks hoisted out of the 3x3 tap loop (computed once, reused 3x).
    col = lax.broadcasted_iota(jnp.int32, (BH, WCmid), 1)
    lrow = lax.broadcasted_iota(jnp.int32, (BH, WCmid), 0) % H    # row in image
    m_up = lrow >= 1                 # tap h-1 valid
    m_down = lrow < H - 1            # tap h+1 valid (also blocks batch leak)
    m_left = col >= Cmid             # tap w-1 valid
    m_right = col < WCmid - Cmid     # tap w+1 valid

    # Vertical taps: sublane rolls over the stacked (B*H) axis (XLU work).
    vtaps = (
        jnp.where(m_up, pltpu.roll(h1, 1, axis=0), 0.0),          # row h-1
        h1,                                                       # row h
        jnp.where(m_down, pltpu.roll(h1, BH - 1, axis=0), 0.0),   # row h+1
    )

    def hshift(v, dj):               # tap at input col w + dj - 1 (lane rolls)
        if dj == 1:
            return v
        if dj == 0:
            return jnp.where(m_left, pltpu.roll(v, Cmid, axis=1), 0.0)
        return jnp.where(m_right, pltpu.roll(v, WCmid - Cmid, axis=1), 0.0)

    acc = jnp.zeros((BH, WCmid), dtype=jnp.float32)
    for di in range(3):
        for dj in range(3):
            k = di * 3 + dj
            acc = acc + hshift(vtaps[di], dj) * w2_ref[k:k + 1, :]
    h2 = jnp.maximum(acc + bias_ref[1:2, :WCmid], 0.0)            # bn2 + relu2

    # ---- conv3(1x1)+bn3: block-diagonal matmul ------------------------------
    h3 = jnp.dot(h2, w3_ref[...], preferred_element_type=jnp.float32)
    h3 = h3 + bias_ref[2:3, :WCout]

    # ---- residual -----------------------------------------------------------
    if has_shortcut:          # shortcut 1x1 conv (computed inside fused `y`)
        h3 = h3 + sc
    elif add_identity:        # identity shortcut (in_planes == out_planes)
        h3 = h3 + x

    out_ref[...] = h3                                             # lane-dense vst


def _blockdiag(w, width):
    """(Ci, Co) -> (width*Ci, width*Co), block-diagonal over spatial positions."""
    ci, co = w.shape
    eye = jnp.eye(width, dtype=w.dtype)
    return (eye[:, None, :, None] * w[None, :, None, :]).reshape(width * ci,
                                                                 width * co)


def prepare_weights(params, *, W, has_shortcut):
    """Fold BN + inflate weights into the packed kernel layout.

    Call this ONCE per set of parameters (hoisted out of the per-call path —
    the block-diagonal build is a W^2-sized materialization)."""
    (w1, a1, b1, w2, a2, b2, w3, a3, b3, ws, as_, bs) = params
    Cmid = w1.shape[1]
    Cout = w3.shape[1]
    WCmid, WCout = W * Cmid, W * Cout
    WCmax = max(WCmid, WCout)

    w1f = w1 * a1                        # fold BN scales into conv weights
    w2f = w2 * a2
    w3f = w3 * a3

    wa = _blockdiag(w1f, W)                                   # (W*Cin, W*Cmid)
    if has_shortcut:                     # fuse shortcut conv into conv1 matmul
        wa = jnp.concatenate([wa, _blockdiag(ws * as_, W)], axis=1)
    w3bd = _blockdiag(w3f, W)                                 # (W*Cmid, W*Cout)
    w2t = jnp.tile(w2f.reshape(9, Cmid), (1, W))              # (9, W*Cmid)

    def _tile_pad(v, wc):
        t = jnp.tile(jnp.reshape(v, (-1,)), W)
        return jnp.pad(t, (0, WCmax - wc))

    bias = jnp.stack([
        _tile_pad(b1, WCmid),
        _tile_pad(b2, WCmid),
        _tile_pad(b3, WCout),
        _tile_pad(bs, WCout) if has_shortcut
        else jnp.zeros((WCmax,), jnp.float32),
    ])                                                        # (4, WCmax)
    return wa, w2t, w3bd, bias


@functools.partial(jax.jit, static_argnames=("stride", "has_shortcut"))
def quantizable_block(x_nhwc, wa, w2t, w3bd, bias, *, stride, has_shortcut):
    """x_nhwc: (B, H, W, Cin) float32 -> (B, H, W, Cout) float32."""
    # TODO(synk): stride>1 path (no residual, output-position depthwise taps)
    # not implemented in the Pallas kernel; this demo config uses stride=1.
    assert stride == 1, "only stride==1 is implemented in the Pallas kernel"

    B, H, W, Cin = x_nhwc.shape
    Cmid = w2t.shape[1] // W
    Cout = w3bd.shape[1] // W

    # Batch folded along sublanes -> single kernel invocation, no grid.
    # (x lane width W*Cin=64 < 128 -> masked loads on x only; negligible here.)
    x_packed = x_nhwc.reshape(B * H, W * Cin)

    kernel = functools.partial(
        _block_kernel, B=B, H=H, W=W, Cin=Cin, Cmid=Cmid, Cout=Cout,
        has_shortcut=has_shortcut,
        add_identity=(not has_shortcut and Cin == Cout))

    # No grid: all (tiny) operands live in VMEM for the single invocation;
    # constant weights are single-buffered by construction (no pipelining).
    out_flat = pl.pallas_call(
        kernel,
        out_shape=jax.ShapeDtypeStruct((B * H, W * Cout), jnp.float32),
    )(x_packed, wa, w2t, w3bd, bias)

    return out_flat.reshape(B, H, W, Cout)


def fold_bn(gamma, beta, mean, var, eps=1e-5):
    a = gamma / jnp.sqrt(var + eps)
    b = beta - mean * a
    return a, b


def make_params(key, in_planes, out_planes, expansion):
    """Deterministic synthetic weights in kernel-friendly layouts."""
    planes = expansion * in_planes
    ks = jax.random.split(key, 16)

    def bn(k, c):
        k1, k2, k3, k4 = jax.random.split(k, 4)
        gamma = 1.0 + 0.1 * jax.random.normal(k1, (c,), jnp.float32)
        beta = 0.1 * jax.random.normal(k2, (c,), jnp.float32)
        mean = 0.1 * jax.random.normal(k3, (c,), jnp.float32)
        var = 0.5 + 0.5 * jnp.abs(jax.random.normal(k4, (c,), jnp.float32))
        return fold_bn(gamma, beta, mean, var)

    w1 = 0.2 * jax.random.normal(ks[0], (in_planes, planes), jnp.float32)
    w2 = 0.2 * jax.random.normal(ks[1], (3, 3, planes), jnp.float32)
    w3 = 0.2 * jax.random.normal(ks[2], (planes, out_planes), jnp.float32)
    ws = 0.2 * jax.random.normal(ks[3], (in_planes, out_planes), jnp.float32)
    a1, b1 = bn(ks[4], planes)
    a2, b2 = bn(ks[5], planes)
    a3, b3 = bn(ks[6], out_planes)
    as_, bs = bn(ks[7], out_planes)
    return (w1, a1, b1, w2, a2, b2, w3, a3, b3, ws, as_, bs)


def reference_block(x_nhwc, params, *, stride, has_shortcut):
    """Pure-JAX reference (same math, no Pallas)."""
    (w1, a1, b1, w2, a2, b2, w3, a3, b3, ws, as_, bs) = params
    B, H, W, Cin = x_nhwc.shape
    h1 = jnp.maximum(jnp.einsum('bhwc,cd->bhwd', x_nhwc, w1) * a1 + b1, 0.0)
    pad = jnp.pad(h1, ((0, 0), (1, 1), (1, 1), (0, 0)))
    acc = jnp.zeros_like(h1)
    for di in range(3):
        for dj in range(3):
            acc = acc + pad[:, di:di + H, dj:dj + W, :] * w2[di, dj]
    if stride != 1:
        acc = acc[:, ::stride, ::stride, :]
    h2 = jnp.maximum(acc * a2 + b2, 0.0)
    h3 = jnp.einsum('bhwc,cd->bhwd', h2, w3) * a3 + b3
    if stride == 1:
        if has_shortcut:
            h3 = h3 + jnp.einsum('bhwc,cd->bhwd', x_nhwc, ws) * as_ + bs
        else:
            h3 = h3 + x_nhwc
    return h3


if __name__ == "__main__":
    # QuantizableBlock(in_planes=4, out_planes=8, expansion=2, stride=1)
    B, Cin, H, W = 2, 4, 16, 16
    Cout, expansion, stride = 8, 2, 1
    has_shortcut = (stride == 1) and (Cin != Cout)

    key = jax.random.PRNGKey(0)
    kx, kp = jax.random.split(key)
    x_nchw = jax.random.normal(kx, (B, Cin, H, W), jnp.float32)   # PyTorch NCHW
    x_nhwc = jnp.transpose(x_nchw, (0, 2, 3, 1))                  # kernel NHWC

    params = make_params(kp, Cin, Cout, expansion)

    # One-time weight inflation (hoisted out of the per-call path).
    prepared = tuple(jax.block_until_ready(a)
                     for a in prepare_weights(params, W=W,
                                              has_shortcut=has_shortcut))

    out = quantizable_block(x_nhwc, *prepared, stride=stride,
                            has_shortcut=has_shortcut)
    out = jax.block_until_ready(out)

    ref = reference_block(x_nhwc, params, stride=stride,
                          has_shortcut=has_shortcut)
    np.testing.assert_allclose(np.asarray(out), np.asarray(ref),
                               rtol=1e-4, atol=1e-4)
    print("KERNEL_OK")
</pallas_src>

<mosaic_0001>
module attributes {stable_mosaic.version = 11 : i64} {
  func.func @_block_kernel(%arg0: memref<32x64xf32, #tpu.memory_space<vmem>>, %arg1: memref<64x256xf32, #tpu.memory_space<vmem>>, %arg2: memref<9x128xf32, #tpu.memory_space<vmem>>, %arg3: memref<128x128xf32, #tpu.memory_space<vmem>>, %arg4: memref<4x128xf32, #tpu.memory_space<vmem>>, %arg5: memref<32x128xf32, #tpu.memory_space<vmem>>) attributes {dimension_semantics = [], scalar_prefetch = 0 : i64, scratch_operands = 0 : i64, tpu.core_type = #tpu.core_type<tc>} {
    %c0 = arith.constant 0 : index
    %c0_0 = arith.constant 0 : index
    %0 = vector.load %arg0[%c0, %c0_0] : memref<32x64xf32, #tpu.memory_space<vmem>>, vector<32x64xf32>
    %c0_1 = arith.constant 0 : index
    %c0_2 = arith.constant 0 : index
    %1 = vector.load %arg1[%c0_1, %c0_2] : memref<64x256xf32, #tpu.memory_space<vmem>>, vector<64x256xf32>
    %cst = arith.constant dense<0.000000e+00> : vector<32x256xf32>
    %2 = tpu.matmul %0, %1, %cst {dimension_numbers = #tpu.dot_dimension_numbers<[1], [0], [0], [1], [0, 0, 1, 1], [], []>} : vector<32x64xf32>, vector<64x256xf32>, vector<32x256xf32> -> vector<32x256xf32>
    %3 = vector.extract_strided_slice %2 {offsets = [0, 0], sizes = [32, 128], strides = [1, 1]} : vector<32x256xf32> to vector<32x128xf32>
    %c0_3 = arith.constant 0 : index
    %c0_4 = arith.constant 0 : index
    %4 = vector.load %arg4[%c0_3, %c0_4] : memref<4x128xf32, #tpu.memory_space<vmem>>, vector<1x128xf32>
    %5 = vector.broadcast %4 : vector<1x128xf32> to vector<32x128xf32>
    %6 = arith.addf %3, %5 : vector<32x128xf32>
    %cst_5 = arith.constant 0.000000e+00 : f32
    %7 = vector.broadcast %cst_5 : f32 to vector<32x128xf32>
    %8 = arith.maximumf %6, %7 : vector<32x128xf32>
    %9 = vector.extract_strided_slice %2 {offsets = [0, 128], sizes = [32, 128], strides = [1, 1]} : vector<32x256xf32> to vector<32x128xf32>
    %c3 = arith.constant 3 : index
    %c0_6 = arith.constant 0 : index
    %10 = vector.load %arg4[%c3, %c0_6] : memref<4x128xf32, #tpu.memory_space<vmem>>, vector<1x128xf32>
    %11 = vector.broadcast %10 : vector<1x128xf32> to vector<32x128xf32>
    %12 = arith.addf %9, %11 : vector<32x128xf32>
    %13 = tpu.iota {dimensions = array<i32: 1>} : vector<32x128xi32>
    %14 = tpu.iota {dimensions = array<i32: 0>} : vector<32x128xi32>
    %c16_i32 = arith.constant 16 : i32
    %c0_i32 = arith.constant 0 : i32
    %15 = arith.cmpi eq, %c16_i32, %c0_i32 : i32
    %c1_i32 = arith.constant 1 : i32
    %16 = arith.select %15, %c1_i32, %c16_i32 : i32
    %17 = vector.broadcast %16 : i32 to vector<32x128xi32>
    %18 = arith.remsi %14, %17 : vector<32x128xi32>
    %c0_i32_7 = arith.constant 0 : i32
    %19 = vector.broadcast %c0_i32_7 : i32 to vector<32x128xi32>
    %20 = arith.cmpi ne, %18, %19 : vector<32x128xi32>
    %c0_i32_8 = arith.constant 0 : i32
    %21 = vector.broadcast %c0_i32_8 : i32 to vector<32x128xi32>
    %22 = arith.cmpi slt, %18, %21 : vector<32x128xi32>
    %c0_i32_9 = arith.constant 0 : i32
    %23 = arith.cmpi slt, %16, %c0_i32_9 : i32
    %24 = vector.broadcast %23 : i1 to vector<32x128xi1>
    %25 = vector.broadcast %24 : vector<32x128xi1> to vector<32x128xi1>
    %26 = arith.xori %22, %25 : vector<32x128xi1>
    %27 = arith.andi %26, %20 : vector<32x128xi1>
    %28 = vector.broadcast %16 : i32 to vector<32x128xi32>
    %29 = arith.addi %18, %28 : vector<32x128xi32>
    %30 = arith.select %27, %29, %18 : vector<32x128xi1>, vector<32x128xi32>
    %c1_i32_10 = arith.constant 1 : i32
    %31 = vector.broadcast %c1_i32_10 : i32 to vector<32x128xi32>
    %32 = arith.cmpi sge, %30, %31 : vector<32x128xi32>
    %c15_i32 = arith.constant 15 : i32
    %33 = vector.broadcast %c15_i32 : i32 to vector<32x128xi32>
    %34 = arith.cmpi slt, %30, %33 : vector<32x128xi32>
    %c8_i32 = arith.constant 8 : i32
    %35 = vector.broadcast %c8_i32 : i32 to vector<32x128xi32>
    %36 = arith.cmpi sge, %13, %35 : vector<32x128xi32>
    %c120_i32 = arith.constant 120 : i32
    %37 = vector.broadcast %c120_i32 : i32 to vector<32x128xi32>
    %38 = arith.cmpi slt, %13, %37 : vector<32x128xi32>
    %c1_i32_11 = arith.constant 1 : i32
    %39 = tpu.dynamic_rotate %8 by %c1_i32_11 dim 0 : vector<32x128xf32>, i32 -> vector<32x128xf32>
    %cst_12 = arith.constant 0.000000e+00 : f32
    %40 = vector.broadcast %cst_12 : f32 to vector<32x128xf32>
    %41 = arith.select %32, %39, %40 : vector<32x128xi1>, vector<32x128xf32>
    %c31_i32 = arith.constant 31 : i32
    %42 = tpu.dynamic_rotate %8 by %c31_i32 dim 0 : vector<32x128xf32>, i32 -> vector<32x128xf32>
    %cst_13 = arith.constant 0.000000e+00 : f32
    %43 = vector.broadcast %cst_13 : f32 to vector<32x128xf32>
    %44 = arith.select %34, %42, %43 : vector<32x128xi1>, vector<32x128xf32>
    %cst_14 = arith.constant 0.000000e+00 : f32
    %45 = vector.broadcast %cst_14 : f32 to vector<32x128xf32>
    %c8_i32_15 = arith.constant 8 : i32
    %46 = tpu.dynamic_rotate %41 by %c8_i32_15 dim 1 : vector<32x128xf32>, i32 -> vector<32x128xf32>
    %cst_16 = arith.constant 0.000000e+00 : f32
    %47 = vector.broadcast %cst_16 : f32 to vector<32x128xf32>
    %48 = arith.select %36, %46, %47 : vector<32x128xi1>, vector<32x128xf32>
    %c0_17 = arith.constant 0 : index
    %c0_18 = arith.constant 0 : index
    %49 = vector.load %arg2[%c0_17, %c0_18] : memref<9x128xf32, #tpu.memory_space<vmem>>, vector<1x128xf32>
    %50 = vector.broadcast %49 : vector<1x128xf32> to vector<32x128xf32>
    %51 = arith.mulf %48, %50 : vector<32x128xf32>
    %52 = arith.addf %45, %51 : vector<32x128xf32>
    %c1 = arith.constant 1 : index
    %c0_19 = arith.constant 0 : index
    %53 = vector.load %arg2[%c1, %c0_19] : memref<9x128xf32, #tpu.memory_space<vmem>>, vector<1x128xf32>
    %54 = vector.broadcast %53 : vector<1x128xf32> to vector<32x128xf32>
    %55 = arith.mulf %41, %54 : vector<32x128xf32>
    %56 = arith.addf %52, %55 : vector<32x128xf32>
    %c120_i32_20 = arith.constant 120 : i32
    %57 = tpu.dynamic_rotate %41 by %c120_i32_20 dim 1 : vector<32x128xf32>, i32 -> vector<32x128xf32>
    %cst_21 = arith.constant 0.000000e+00 : f32
    %58 = vector.broadcast %cst_21 : f32 to vector<32x128xf32>
    %59 = arith.select %38, %57, %58 : vector<32x128xi1>, vector<32x128xf32>
    %c2 = arith.constant 2 : index
    %c0_22 = arith.constant 0 : index
    %60 = vector.load %arg2[%c2, %c0_22] : memref<9x128xf32, #tpu.memory_space<vmem>>, vector<1x128xf32>
    %61 = vector.broadcast %60 : vector<1x128xf32> to vector<32x128xf32>
    %62 = arith.mulf %59, %61 : vector<32x128xf32>
    %63 = arith.addf %56, %62 : vector<32x128xf32>
    %c8_i32_23 = arith.constant 8 : i32
    %64 = tpu.dynamic_rotate %8 by %c8_i32_23 dim 1 : vector<32x128xf32>, i32 -> vector<32x128xf32>
    %cst_24 = arith.constant 0.000000e+00 : f32
    %65 = vector.broadcast %cst_24 : f32 to vector<32x128xf32>
    %66 = arith.select %36, %64, %65 : vector<32x128xi1>, vector<32x128xf32>
    %c3_25 = arith.constant 3 : index
    %c0_26 = arith.constant 0 : index
    %67 = vector.load %arg2[%c3_25, %c0_26] : memref<9x128xf32, #tpu.memory_space<vmem>>, vector<1x128xf32>
    %68 = vector.broadcast %67 : vector<1x128xf32> to vector<32x128xf32>
    %69 = arith.mulf %66, %68 : vector<32x128xf32>
    %70 = arith.addf %63, %69 : vector<32x128xf32>
    %c4 = arith.constant 4 : index
    %c0_27 = arith.constant 0 : index
    %71 = vector.load %arg2[%c4, %c0_27] : memref<9x128xf32, #tpu.memory_space<vmem>>, vector<1x128xf32>
    %72 = vector.broadcast %71 : vector<1x128xf32> to vector<32x128xf32>
    %73 = arith.mulf %8, %72 : vector<32x128xf32>
    %74 = arith.addf %70, %73 : vector<32x128xf32>
    %c120_i32_28 = arith.constant 120 : i32
    %75 = tpu.dynamic_rotate %8 by %c120_i32_28 dim 1 : vector<32x128xf32>, i32 -> vector<32x128xf32>
    %cst_29 = arith.constant 0.000000e+00 : f32
    %76 = vector.broadcast %cst_29 : f32 to vector<32x128xf32>
    %77 = arith.select %38, %75, %76 : vector<32x128xi1>, vector<32x128xf32>
    %c5 = arith.constant 5 : index
    %c0_30 = arith.constant 0 : index
    %78 = vector.load %arg2[%c5, %c0_30] : memref<9x128xf32, #tpu.memory_space<vmem>>, vector<1x128xf32>
    %79 = vector.broadcast %78 : vector<1x128xf32> to vector<32x128xf32>
    %80 = arith.mulf %77, %79 : vector<32x128xf32>
    %81 = arith.addf %74, %80 : vector<32x128xf32>
    %c8_i32_31 = arith.constant 8 : i32
    %82 = tpu.dynamic_rotate %44 by %c8_i32_31 dim 1 : vector<32x128xf32>, i32 -> vector<32x128xf32>
    %cst_32 = arith.constant 0.000000e+00 : f32
    %83 = vector.broadcast %cst_32 : f32 to vector<32x128xf32>
    %84 = arith.select %36, %82, %83 : vector<32x128xi1>, vector<32x128xf32>
    %c6 = arith.constant 6 : index
    %c0_33 = arith.constant 0 : index
    %85 = vector.load %arg2[%c6, %c0_33] : memref<9x128xf32, #tpu.memory_space<vmem>>, vector<1x128xf32>
    %86 = vector.broadcast %85 : vector<1x128xf32> to vector<32x128xf32>
    %87 = arith.mulf %84, %86 : vector<32x128xf32>
    %88 = arith.addf %81, %87 : vector<32x128xf32>
    %c7 = arith.constant 7 : index
    %c0_34 = arith.constant 0 : index
    %89 = vector.load %arg2[%c7, %c0_34] : memref<9x128xf32, #tpu.memory_space<vmem>>, vector<1x128xf32>
    %90 = vector.broadcast %89 : vector<1x128xf32> to vector<32x128xf32>
    %91 = arith.mulf %44, %90 : vector<32x128xf32>
    %92 = arith.addf %88, %91 : vector<32x128xf32>
    %c120_i32_35 = arith.constant 120 : i32
    %93 = tpu.dynamic_rotate %44 by %c120_i32_35 dim 1 : vector<32x128xf32>, i32 -> vector<32x128xf32>
    %cst_36 = arith.constant 0.000000e+00 : f32
    %94 = vector.broadcast %cst_36 : f32 to vector<32x128xf32>
    %95 = arith.select %38, %93, %94 : vector<32x128xi1>, vector<32x128xf32>
    %c8 = arith.constant 8 : index
    %c0_37 = arith.constant 0 : index
    %96 = vector.load %arg2[%c8, %c0_37] : memref<9x128xf32, #tpu.memory_space<vmem>>, vector<1x128xf32>
    %97 = vector.broadcast %96 : vector<1x128xf32> to vector<32x128xf32>
    %98 = arith.mulf %95, %97 : vector<32x128xf32>
    %99 = arith.addf %92, %98 : vector<32x128xf32>
    %c1_38 = arith.constant 1 : index
    %c0_39 = arith.constant 0 : index
    %100 = vector.load %arg4[%c1_38, %c0_39] : memref<4x128xf32, #tpu.memory_space<vmem>>, vector<1x128xf32>
    %101 = vector.broadcast %100 : vector<1x128xf32> to vector<32x128xf32>
    %102 = arith.addf %99, %101 : vector<32x128xf32>
    %cst_40 = arith.constant 0.000000e+00 : f32
    %103 = vector.broadcast %cst_40 : f32 to vector<32x128xf32>
    %104 = arith.maximumf %102, %103 : vector<32x128xf32>
    %c0_41 = arith.constant 0 : index
    %c0_42 = arith.constant 0 : index
    %105 = vector.load %arg3[%c0_41, %c0_42] : memref<128x128xf32, #tpu.memory_space<vmem>>, vector<128x128xf32>
    %cst_43 = arith.constant dense<0.000000e+00> : vector<32x128xf32>
    %106 = tpu.matmul %104, %105, %cst_43 {dimension_numbers = #tpu.dot_dimension_numbers<[1], [0], [0], [1], [0, 0, 1, 1], [], []>} : vector<32x128xf32>, vector<128x128xf32>, vector<32x128xf32> -> vector<32x128xf32>
    %c2_44 = arith.constant 2 : index
    %c0_45 = arith.constant 0 : index
    %107 = vector.load %arg4[%c2_44, %c0_45] : memref<4x128xf32, #tpu.memory_space<vmem>>, vector<1x128xf32>
    %108 = vector.broadcast %107 : vector<1x128xf32> to vector<32x128xf32>
    %109 = arith.addf %106, %108 : vector<32x128xf32>
    %110 = arith.addf %109, %12 : vector<32x128xf32>
    %c0_46 = arith.constant 0 : index
    %c0_47 = arith.constant 0 : index
    %111 = vector.load %arg5[%c0_46, %c0_47] : memref<32x128xf32, #tpu.memory_space<vmem>>, vector<32x128xf32>
    tpu.vector_store %arg5[%c0_46, %c0_47], %110 {strides = array<i32>} : memref<32x128xf32, #tpu.memory_space<vmem>>, vector<32x128xf32>,
    return
  }
}

</mosaic_0001>

<bundles_post_ra>
// kernel: quantizable_block.1
= control target key start
LH: loop header
LB: loop body
LE: loop exit
PB: predicated region body
PF: predicated region fallthrough
CT: control target
= control target key end

     0   :  { %v653_v3 = vmov 0.0   ;;  %vm40_vm0 = vcmask 523264   ;;  %v164_v23 = vlaneseq  ;;  %s654_s9 = smov 8   ;;  %s1054_s1 = inlined_call_operand.vmem [shape: f32[64,256], index: 1, kind: input, shape index: {}]   ;;  %s1055_s0 = inlined_call_operand.vmem [shape: f32[32,64], index: 0, kind: input, shape index: {}]   ;;  %s1056_s4 = inlined_call_operand.vmem [shape: f32[4,128], index: 4, kind: input, shape index: {}]   ;;  %s1057_s3 = inlined_call_operand.vmem [shape: f32[128,128], index: 3, kind: input, shape index: {}]   ;;  %s1058_s2 = inlined_call_operand.vmem [shape: f32[9,128], index: 2, kind: input, shape index: {}]   ;;  %s1059_s5 = inlined_call_operand.vmem [shape: f32[32,128], index: 5, kind: output, shape index: {}]  }
   0x1   :  { %v39_v0 = vld [vmem:[%s1054_s1 + $0x78] sm:$0xff]  ;;  %v38_v1 = vld [vmem:[%s1054_s1 + $0x70] sm:$0xff]  ;;  %v37_v2 = vld [vmem:[%s1054_s1 + $0x68] sm:$0xff]  ;;  %117 = vmatprep.mubr.f32.mxu0 %v653_v3 }
   0x2   :  { %69 = vmatprep.subr.mxu0 %v39_v0  ;;  %v36_v4 = vld [vmem:[%s1054_s1 + $0x60] sm:$0xff]  ;;  %v35_v5 = vld [vmem:[%s1054_s1 + $0x58] sm:$0xff]  ;;  %v34_v6 = vld [vmem:[%s1054_s1 + $0x50] sm:$0xff]  ;;  %v754_v28 = vshrl.u32 %v164_v23, 7 }
   0x3   :  { %70 = vmatpush1.msra.mxu0 %v38_v1  ;;  %v33_v7 = vld [vmem:[%s1054_s1 + $0x48] sm:$0xff]  ;;  %v32_v8 = vld [vmem:[%s1054_s1 + $0x40] sm:$0xff]  ;;  %v31_v9 = vld [vmem:[%s1054_s1 + $0x38] sm:$0xff] }
   0x4   :  { %71 = vmatprep.subr.mxu0 %v37_v2  ;;  %v30_v10 = vld [vmem:[%s1054_s1 + $0x30] sm:$0xff]  ;;  %v29_v11 = vld [vmem:[%s1054_s1 + $0x28] sm:$0xff]  ;;  %v28_v12 = vld [vmem:[%s1054_s1 + $0x20] sm:$0xff]  ;;  %vm233_vm1 = vcmp.lt.s32.totalorder %v754_v28, 1  ;;  %v169_v33 = vadd.s32 16, %v754_v28  ;;  %v175_v52 = vand.u32 15, %v754_v28 }
   0x5   :  { %72 = vmatpush1.msra.mxu0 %v36_v4  ;;  %v27_v13 = vld [vmem:[%s1054_s1 + $0x18] sm:$0xff]  ;;  %v26_v14 = vld [vmem:[%s1054_s1 + $0x10] sm:$0xff]  ;;  %v25_v15 = vld [vmem:[%s1054_s1 + $0x8] sm:$0xff]  ;;  %v168_v53 = vadd.s32 8, %v754_v28  ;;  %vm246_vm4 = vcmp.lt.s32.totalorder %v754_v28, 7 }
   0x6   :  { %73 = vmatprep.subr.mxu0 %v35_v5  ;;  %v24_v16 = vld [vmem:[%s1054_s1] sm:$0xff]  ;;  %v21_v18 = vld [vmem:[%s1055_s0 + $0x8] sm:$0xff]  ;;  %v22_v19 = vld [vmem:[%s1055_s0 + $0x10] sm:$0xff]  ;;  %v189_v41 = vand.u32 15, %v169_v33  ;;  %vm219_vm3 = vcmp.ge.s32.totalorder %v175_v52, 1 }
   0x7   :  { %74 = vmatpush1.msra.mxu0 %v34_v6  ;;  %v20_v17 = vld [vmem:[%s1055_s0] sm:$0xff]  ;;  %v23_v20 = vld [vmem:[%s1055_s0 + $0x18] sm:$0xff]  ;;  %s655_s0 = smov 120   ;;  %v471_v47 = vld [vmem:[%s1057_s3 + $0x70] sm:$0xff]  ;;  %v182_v58 = vand.u32 15, %v168_v53 }
   0x8   :  { %75 = vmatprep.subr.mxu0 %v33_v7  ;;  %v579_v21 = vld [vmem:[%s1056_s4] ss:$0 sm:$0xff]  ;;  %v472_v44 = vld [vmem:[%s1057_s3 + $0x78] sm:$0xff]  ;;  %vm221_vm2 = vcmp.ge.s32.totalorder %v189_v41, 1  ;;  %v470_v48 = vld [vmem:[%s1057_s3 + $0x68] sm:$0xff]  ;;  %v170_v7 = vadd.s32 24, %v754_v28 }
   0x9   :  { %76 = vmatpush1.msra.mxu0 %v32_v8  ;;  %612 = vmatprep.subr.mxu1 %v472_v44  ;;  %v469_v51 = vld [vmem:[%s1057_s3 + $0x60] sm:$0xff]  ;;  %v468_v54 = vld [vmem:[%s1057_s3 + $0x58] sm:$0xff]  ;;  %v467_v56 = vld [vmem:[%s1057_s3 + $0x50] sm:$0xff]  ;;  %vm224_vm5 = vcmp.lt.s32.totalorder %v182_v58, 15 }
   0xa   :  { %77 = vmatprep.subr.mxu0 %v31_v9  ;;  %613 = vmatpush3.msra.mxu1 %v472_v44  ;;  %v466_v60 = vld [vmem:[%s1057_s3 + $0x48] sm:$0xff]  ;;  %v465_v63 = vld [vmem:[%s1057_s3 + $0x40] sm:$0xff]  ;;  %v464_v1 = vld [vmem:[%s1057_s3 + $0x38] sm:$0xff] }
   0xb   :  { %78 = vmatpush1.msra.mxu0 %v30_v10  ;;  %614 = vmatprep.subr.mxu1 %v471_v47  ;;  %v462_v4 = vld [vmem:[%s1057_s3 + $0x28] sm:$0xff]  ;;  %v461_v5 = vld [vmem:[%s1057_s3 + $0x20] sm:$0xff]  ;;  %v460_v8 = vld [vmem:[%s1057_s3 + $0x18] sm:$0xff] }
   0xc   :  { %79 = vmatprep.subr.mxu0 %v29_v11  ;;  %615 = vmatpush3.msra.mxu1 %v471_v47  ;;  %v459_v10 = vld [vmem:[%s1057_s3 + $0x10] sm:$0xff]  ;;  %v584_v47 = vld [vmem:[%s1058_s2 + $0x3] ss:$0 sm:$0xff]  ;;  %v585_v58 = vld [vmem:[%s1058_s2 + $0x4] ss:$0 sm:$0xff] }
   0xd   :  { %80 = vmatpush1.msra.mxu0 %v28_v12  ;;  %616 = vmatprep.subr.mxu1 %v470_v48  ;;  %v196_v12 = vand.u32 15, %v170_v7 }
   0xe   :  { %81 = vmatprep.subr.mxu0 %v27_v13  ;;  %617 = vmatpush3.msra.mxu1 %v470_v48  ;;  %v458_v13 = vld [vmem:[%s1057_s3 + $0x8] sm:$0xff] }
   0xf   :  { %82 = vmatpush1.msra.mxu0 %v26_v14  ;;  %618 = vmatprep.subr.mxu1 %v469_v51  ;;  %v457_v14 = vld [vmem:[%s1057_s3] sm:$0xff]  ;;  %vm226_vm6 = vcmp.lt.s32.totalorder %v196_v12, 15 }
  0x10   :  { %83 = vmatprep.subr.mxu0 %v25_v15  ;;  %619 = vmatpush3.msra.mxu1 %v469_v51 }
  0x11   :  { %84 = vmatpush1.msra.mxu0 %v24_v16  ;;  %620 = vmatprep.subr.mxu1 %v468_v54 }
  0x12   :  { %575 = vmatmul.mubr.msk.f32.vlgmr.msra.gmra.mxu0 %vm40_vm0, %v20_v17  ;;  %621 = vmatpush3.msra.mxu1 %v468_v54 }
  0x13   :  { %123 = vmatprep.mubr.f32.mxu0 %v653_v3  ;;  %622 = vmatprep.subr.mxu1 %v467_v56 }
  0x14   :  { %623 = vmatpush3.msra.mxu1 %v467_v56 }
  0x15   :  { %624 = vmatprep.subr.mxu1 %v466_v60 }
  0x16   :  { %576 = vmatmul.mubr.msk.f32.gmra.mxu0 %vm40_vm0, %v21_v18  ;;  %625 = vmatpush3.msra.mxu1 %v466_v60 }
  0x17   :  { %129 = vmatprep.mubr.f32.mxu0 %v653_v3  ;;  %626 = vmatprep.subr.mxu1 %v465_v63 }
  0x18   :  { %627 = vmatpush3.msra.mxu1 %v465_v63 }
  0x19   :  { %628 = vmatprep.subr.mxu1 %v464_v1 }
  0x1a   :  { %577 = vmatmul.mubr.msk.f32.gmra.mxu0 %vm40_vm0, %v22_v19  ;;  %629 = vmatpush3.msra.mxu1 %v464_v1  ;;  %v911_v19 = vand.u32 127, %v164_v23 }
  0x1b   :  { %135 = vmatprep.mubr.f32.mxu0 %v653_v3  ;;  %v463_v3 = vld [vmem:[%s1057_s3 + $0x30] sm:$0xff] }
  0x1c   :  { %630 = vmatprep.subr.mxu1 %v463_v3  ;;  %vm227_vm7 = vcmp.ge.s32.totalorder %v911_v19, 8  ;;  %vm228_vm8 = vcmp.lt.s32.totalorder %v911_v19, 120  ;;  %v580_v19 = vld [vmem:[%s1056_s4 + $0x3] ss:$0 sm:$0xff] }
  0x1d   :  { %631 = vmatpush3.msra.mxu1 %v463_v3 }
  0x1e   :  { %578 = vmatmul.mubr.msk.f32.gmra.mxu0 %vm40_vm0, %v23_v20  ;;  %632 = vmatprep.subr.mxu1 %v462_v4 }
  0x1f   :  { %633 = vmatpush3.msra.mxu1 %v462_v4 }
  0x20   :  { %634 = vmatprep.subr.mxu1 %v461_v5 }
  0x21   :  { %635 = vmatpush3.msra.mxu1 %v461_v5 }
  0x22   :  { %636 = vmatprep.subr.mxu1 %v460_v8 }
  0x23   :  { %637 = vmatpush3.msra.mxu1 %v460_v8 }
  0x24   :  { %638 = vmatprep.subr.mxu1 %v459_v10 }
  0x25   :  { %639 = vmatpush3.msra.mxu1 %v459_v10 }
  0x26   :  { %640 = vmatprep.subr.mxu1 %v458_v13 }
  0x27   :  { %641 = vmatpush3.msra.mxu1 %v458_v13 }
  0x28   :  { %642 = vmatprep.subr.mxu1 %v457_v14 }
  0x29   :  { %643 = vmatpush3.msra.mxu1 %v457_v14 }
  0xd2   :  { %v119_v22 = vpop.f32.mrf.mxu0 }
  0xd3   :  { %v147_v24 = vadd.f32 %v579_v21, %v119_v22  ;;  %v923_v22 = vld [vmem:[%s1058_s2] ss:$0 sm:$0xff] }
  0xd4   :  { %v749_v25 = vpop.f32.mrf.mxu0 }
  0xd5   :  { %v751_v26 = vmax.f32 %v147_v24, 0.0 }
  0xd6   :  { %v125_v27 = vpop.f32.mrf.mxu0 }
  0xd7   :  { %v148_v29 = vadd.f32 %v579_v21, %v125_v27  ;;  %318 = vrot.lane.b32.xlu1 %v751_v26, %s654_s9  ;;  %v229_v35 = vrot.slane %v751_v26, 7  ;;  %v242_v6 = vrot.slane %v751_v26, 1 }
  0xd8   :  { %v758_v30 = vpop.f32.mrf.mxu0 }
  0xd9   :  { %v760_v31 = vmax.f32 %v148_v29, 0.0 }
  0xda   :  { %v131_v32 = vpop.f32.mrf.mxu0 }
  0xdb   :  { %v149_v34 = vadd.f32 %v579_v21, %v131_v32  ;;  %356 = vrot.lane.b32.xlu1 %v751_v26, %s655_s0  ;;  %v230_v36 = vrot.slane %v760_v31, 7  ;;  %v243_v61 = vrot.slane %v760_v31, 1  ;;  %v349_v60 = vmul.f32 %v585_v58, %v760_v31 }
  0xdc   :  { %v768_v37 = vpop.f32.mrf.mxu0 }
  0xdd   :  { %v770_v38 = vmax.f32 %v149_v34, 0.0  ;;  %v774_v39 = vsel %vm233_vm1, %v229_v35, %v230_v36  ;;  %v872_v9 = vsel %vm246_vm4, %v242_v6, %v243_v61 }
  0xde   :  { %257 = vrot.lane.b32.xlu0 %v774_v39, %s654_s9  ;;  %v137_v40 = vpop.f32.mrf.mxu0 }
  0xdf   :  { %v150_v42 = vadd.f32 %v579_v21, %v137_v40  ;;  %320 = vrot.lane.b32.xlu1 %v760_v31, %s654_s9  ;;  %v231_v43 = vrot.slane %v770_v38, 7  ;;  %v244_v59 = vrot.slane %v770_v38, 1  ;;  %v918_v21 = vld [vmem:[%s1058_s2 + $0x1] ss:$0 sm:$0xff]  ;;  %v350_v7 = vmul.f32 %v585_v58, %v770_v38 }
  0xe0   :  { %v286_v28 = vmul.f32 %v918_v21, %v774_v39 }
  0xe1   :  { %v784_v45 = vmax.f32 %v150_v42, 0.0  ;;  %v235_v46 = vsel %vm233_vm1, %v230_v36, %v231_v43  ;;  %v248_v0 = vsel %vm246_vm4, %v243_v61, %v244_v59  ;;  %v583_v36 = vld [vmem:[%s1058_s2 + $0x2] ss:$0 sm:$0xff]  ;;  %v586_v61 = vld [vmem:[%s1058_s2 + $0x5] ss:$0 sm:$0xff] }
  0xe2   :  { %322 = vrot.lane.b32.xlu0 %v770_v38, %s654_s9  ;;  %v798_v49 = vsel %vm221_vm2, %v235_v46, 0.0  ;;  %v848_v2 = vsel %vm224_vm5, %v248_v0, 0.0 }
  0xe3   :  { %358 = vrot.lane.b32.xlu1 %v760_v31, %s655_s0  ;;  %v232_v50 = vrot.slane %v784_v45, 7  ;;  %v245_v11 = vrot.slane %v784_v45, 1  ;;  %v287_v42 = vmul.f32 %v918_v21, %v798_v49 }
  0xe5   :  { %v817_v55 = vsel %vm233_vm1, %v231_v43, %v232_v50  ;;  %v237_v57 = vsel %vm233_vm1, %v232_v50, %v229_v35  ;;  %v250_v15 = vsel %vm246_vm4, %v245_v11, %v242_v6  ;;  %v896_v16 = vsel %vm246_vm4, %v244_v59, %v245_v11  ;;  %v964_v11 = vld [vmem:[%s1058_s2 + $0x6] ss:$0 sm:$0xff] }
  0xe6   :  { %259 = vrot.lane.b32.xlu0 %v798_v49, %s654_s9  ;;  %v833_v62 = vsel %vm219_vm3, %v237_v57, 0.0  ;;  %v900_v17 = vsel %vm226_vm6, %v250_v15, 0.0  ;;  %v288_v15 = vmul.f32 %v918_v21, %v817_v55 }
  0xe7   :  { %295 = vrot.lane.b32.xlu1 %v774_v39, %s655_s0 }
  0xea   :  { %297 = vrot.lane.b32.xlu0 %v798_v49, %s655_s0 }
  0xeb   :  { %299 = vrot.lane.b32.xlu1 %v817_v55, %s655_s0 }
  0xee   :  { %324 = vrot.lane.b32.xlu0 %v784_v45, %s654_s9 }
  0xef   :  { %293 = vrot.lane.b32.xlu1 %v833_v62, %s655_s0 }
  0xf2   :  { %261 = vrot.lane.b32.xlu0 %v817_v55, %s654_s9 }
  0xf3   :  { %383 = vrot.lane.b32.xlu1 %v848_v2, %s654_s9 }
  0xf6   :  { %255 = vrot.lane.b32.xlu0 %v833_v62, %s654_s9 }
  0xf7   :  { %362 = vrot.lane.b32.xlu1 %v784_v45, %s655_s0 }
  0xfa   :  { %381 = vrot.lane.b32.xlu0 %v872_v9, %s654_s9 }
  0xfb   :  { %419 = vrot.lane.b32.xlu1 %v872_v9, %s655_s0 }
  0xfe   :  { %360 = vrot.lane.b32.xlu0 %v770_v38, %s655_s0 }
  0xff   :  { %421 = vrot.lane.b32.xlu1 %v848_v2, %s655_s0 }
 0x102   :  { %385 = vrot.lane.b32.xlu0 %v896_v16, %s654_s9 }
 0x103   :  { %425 = vrot.lane.b32.xlu1 %v900_v17, %s655_s0 }
 0x106   :  { %387 = vrot.lane.b32.xlu0 %v900_v17, %s654_s9 }
 0x10a   :  { %423 = vrot.lane.b32.xlu0 %v896_v16, %s655_s0 }
 0x149   :  { %v908_v18 = vpop.permute.xlu1 %318 }
 0x14d   :  { %v913_v20 = vpop.permute.xlu1 %356 }
 0x150   :  { %v258_v24 = vpop.permute.xlu0 %257 }
 0x151   :  { %v264_v27 = vsel %vm227_vm7, %v258_v24, 0.0  ;;  %v321_v23 = vpop.permute.xlu1 %320 }
 0x152   :  { %v273_v29 = vmul.f32 %v923_v22, %v264_v27  ;;  %v327_v39 = vsel %vm227_vm7, %v321_v23, 0.0 }
 0x153   :  { %v336_v51 = vmul.f32 %v584_v47, %v327_v39 }
 0x154   :  { %v290_v32 = vadd.f32 %v286_v28, %v273_v29  ;;  %v323_v33 = vpop.permute.xlu0 %322  ;;  %v981_v28 = vld [vmem:[%s1058_s2 + $0x7] ss:$0 sm:$0xff] }
 0x155   :  { %v359_v34 = vpop.permute.xlu1 %358  ;;  %v328_v52 = vsel %vm227_vm7, %v323_v33, 0.0  ;;  %v412_v55 = vmul.f32 %v981_v28, %v848_v2 }
 0x156   :  { %v365_v56 = vsel %vm228_vm8, %v359_v34, 0.0  ;;  %v337_v63 = vmul.f32 %v584_v47, %v328_v52  ;;  %v351_v52 = vmul.f32 %v585_v58, %v784_v45 }
 0x157   :  { %v374_v3 = vmul.f32 %v586_v61, %v365_v56 }
 0x158   :  { %v260_v35 = vpop.permute.xlu0 %259 }
 0x159   :  { %v265_v40 = vsel %vm227_vm7, %v260_v35, 0.0  ;;  %v296_v41 = vpop.permute.xlu1 %295 }
 0x15a   :  { %v274_v43 = vmul.f32 %v923_v22, %v265_v40  ;;  %v302_v44 = vsel %vm228_vm8, %v296_v41, 0.0 }
 0x15b   :  { %v311_v46 = vmul.f32 %v583_v36, %v302_v44 }
 0x15c   :  { %v291_v48 = vadd.f32 %v287_v42, %v274_v43  ;;  %v298_v50 = vpop.permute.xlu0 %297  ;;  %v285_v42 = vmul.f32 %v918_v21, %v833_v62 }
 0x15d   :  { %v315_v49 = vadd.f32 %v311_v46, %v290_v32  ;;  %v303_v53 = vsel %vm228_vm8, %v298_v50, 0.0  ;;  %v300_v54 = vpop.permute.xlu1 %299  ;;  %v326_v46 = vsel %vm227_vm7, %v908_v18, 0.0 }
 0x15e   :  { %v312_v57 = vmul.f32 %v583_v36, %v303_v53  ;;  %v304_v12 = vsel %vm228_vm8, %v300_v54, 0.0  ;;  %v335_v62 = vmul.f32 %v584_v47, %v326_v46 }
 0x15f   :  { %v340_v59 = vadd.f32 %v336_v51, %v315_v49  ;;  %v313_v29 = vmul.f32 %v583_v36, %v304_v12 }
 0x160   :  { %v316_v0 = vadd.f32 %v312_v57, %v291_v48  ;;  %v325_v1 = vpop.permute.xlu0 %324 }
 0x161   :  { %v294_v4 = vpop.permute.xlu1 %293  ;;  %v353_v5 = vadd.f32 %v349_v60, %v340_v59  ;;  %v329_v27 = vsel %vm227_vm7, %v325_v1, 0.0  ;;  %v348_v60 = vmul.f32 %v585_v58, %v751_v26 }
 0x162   :  { %v341_v6 = vadd.f32 %v337_v63, %v316_v0  ;;  %v301_v34 = vsel %vm228_vm8, %v294_v4, 0.0  ;;  %v338_v39 = vmul.f32 %v584_v47, %v329_v27 }
 0x163   :  { %v378_v8 = vadd.f32 %v374_v3, %v353_v5  ;;  %v310_v50 = vmul.f32 %v583_v36, %v301_v34  ;;  %v589_v3 = vld [vmem:[%s1058_s2 + $0x8] ss:$0 sm:$0xff] }
 0x164   :  { %v262_v10 = vpop.permute.xlu0 %261  ;;  %v354_v31 = vadd.f32 %v350_v7, %v341_v6 }
 0x165   :  { %v266_v13 = vsel %vm227_vm7, %v262_v10, 0.0  ;;  %v384_v14 = vpop.permute.xlu1 %383 }
 0x166   :  { %v275_v38 = vmul.f32 %v923_v22, %v266_v13  ;;  %v390_v24 = vsel %vm227_vm7, %v384_v14, 0.0  ;;  %v411_v13 = vmul.f32 %v981_v28, %v872_v9 }
 0x167   :  { %v399_v23 = vmul.f32 %v964_v11, %v390_v24 }
 0x168   :  { %v292_v32 = vadd.f32 %v288_v15, %v275_v38  ;;  %v256_v33 = vpop.permute.xlu0 %255  ;;  %v413_v15 = vmul.f32 %v981_v28, %v896_v16 }
 0x169   :  { %v403_v35 = vadd.f32 %v399_v23, %v378_v8  ;;  %v263_v40 = vsel %vm227_vm7, %v256_v33, 0.0  ;;  %v363_v41 = vpop.permute.xlu1 %362 }
 0x16a   :  { %v317_v43 = vadd.f32 %v313_v29, %v292_v32  ;;  %v272_v44 = vmul.f32 %v923_v22, %v263_v40  ;;  %v367_v2 = vsel %vm228_vm8, %v363_v41, 0.0  ;;  %v364_v22 = vsel %vm228_vm8, %v913_v20, 0.0  ;;  %v590_v29 = vld [vmem:[%s1056_s4 + $0x1] ss:$0 sm:$0xff] }
 0x16b   :  { %v416_v48 = vadd.f32 %v412_v55, %v403_v35  ;;  %v376_v57 = vmul.f32 %v586_v61, %v367_v2  ;;  %v373_v47 = vmul.f32 %v586_v61, %v364_v22  ;;  %v414_v35 = vmul.f32 %v981_v28, %v900_v17  ;;  %v591_v17 = vld [vmem:[%s1056_s4 + $0x2] ss:$0 sm:$0xff] }
 0x16c   :  { %v289_v51 = vadd.f32 %v285_v42, %v272_v44  ;;  %v342_v49 = vadd.f32 %v338_v39, %v317_v43  ;;  %v382_v53 = vpop.permute.xlu0 %381 }
 0x16d   :  { %v420_v54 = vpop.permute.xlu1 %419  ;;  %v389_v36 = vsel %vm227_vm7, %v382_v53, 0.0 }
 0x16e   :  { %v314_v21 = vadd.f32 %v310_v50, %v289_v51  ;;  %v355_v56 = vadd.f32 %v351_v52, %v342_v49  ;;  %v398_v58 = vmul.f32 %v964_v11, %v389_v36  ;;  %v427_v8 = vsel %vm228_vm8, %v420_v54, 0.0 }
 0x16f   :  { %v436_v38 = vmul.f32 %v589_v3, %v427_v8  ;;  %v161_v54 = vadd.f32 %v580_v19, %v758_v30 }
 0x170   :  { %v339_v18 = vadd.f32 %v335_v62, %v314_v21  ;;  %v380_v59 = vadd.f32 %v376_v57, %v355_v56  ;;  %v361_v63 = vpop.permute.xlu0 %360  ;;  %v160_v56 = vadd.f32 %v580_v19, %v749_v25 }
 0x171   :  { %v366_v45 = vsel %vm228_vm8, %v361_v63, 0.0  ;;  %v422_v0 = vpop.permute.xlu1 %421 }
 0x172   :  { %v352_v1 = vadd.f32 %v348_v60, %v339_v18  ;;  %v375_v4 = vmul.f32 %v586_v61, %v366_v45  ;;  %v428_v20 = vsel %vm228_vm8, %v422_v0, 0.0  ;;  %v139_v18 = vpop.f32.mrf.mxu0  ;;  %v162_v45 = vadd.f32 %v580_v19, %v768_v37 }
 0x173   :  { %v437_v5 = vmul.f32 %v589_v3, %v428_v20  ;;  %v163_v63 = vadd.f32 %v580_v19, %v139_v18 }
 0x174   :  { %v377_v26 = vadd.f32 %v373_v47, %v352_v1  ;;  %v379_v6 = vadd.f32 %v375_v4, %v354_v31  ;;  %v386_v7 = vpop.permute.xlu0 %385 }
 0x175   :  { %v441_v10 = vadd.f32 %v437_v5, %v416_v48  ;;  %v391_v12 = vsel %vm227_vm7, %v386_v7, 0.0  ;;  %v426_v31 = vpop.permute.xlu1 %425 }
 0x176   :  { %v402_v61 = vadd.f32 %v398_v58, %v377_v26  ;;  %v400_v14 = vmul.f32 %v964_v11, %v391_v12  ;;  %v430_v34 = vsel %vm228_vm8, %v426_v31, 0.0 }
 0x177   :  { %v450_v16 = vadd.f32 %v590_v29, %v441_v10  ;;  %v439_v43 = vmul.f32 %v589_v3, %v430_v34 }
 0x178   :  { %v404_v24 = vadd.f32 %v400_v14, %v379_v6  ;;  %v388_v27 = vpop.permute.xlu0 %387  ;;  %v415_v23 = vadd.f32 %v411_v13, %v402_v61 }
 0x179   :  { %v392_v32 = vsel %vm227_vm7, %v388_v27, 0.0 }
 0x17a   :  { %v401_v9 = vmul.f32 %v964_v11, %v392_v32  ;;  %v417_v33 = vadd.f32 %v413_v15, %v404_v24  ;;  %v440_v55 = vadd.f32 %v436_v38, %v415_v23  ;;  %v454_v11 = vmax.f32 %v450_v16, 0.0 }
 0x17c   :  { %v405_v40 = vadd.f32 %v401_v9, %v380_v59  ;;  %v424_v41 = vpop.permute.xlu0 %423  ;;  %v449_v42 = vadd.f32 %v590_v29, %v440_v55 }
 0x17d   :  { %v429_v39 = vsel %vm228_vm8, %v424_v41, 0.0 }
 0x17e   :  { %v418_v44 = vadd.f32 %v414_v35, %v405_v40  ;;  %v438_v46 = vmul.f32 %v589_v3, %v429_v39  ;;  %v453_v2 = vmax.f32 %v449_v42, 0.0 }
 0x180   :  { %v442_v48 = vadd.f32 %v438_v46, %v417_v33  ;;  %644 = vmatprep.mubr.f32.mxu1 %v453_v2  ;;  %v443_v50 = vadd.f32 %v439_v43, %v418_v44 }
 0x181   :  { %645 = vmatmul.mubr.f32.vlgmr.msra.gmra.mxu1 %v454_v11 }
 0x182   :  { %v451_v51 = vadd.f32 %v590_v29, %v442_v48  ;;  %v452_v52 = vadd.f32 %v590_v29, %v443_v50 }
 0x184   :  { %v455_v49 = vmax.f32 %v451_v51, 0.0  ;;  %v456_v53 = vmax.f32 %v452_v52, 0.0 }
 0x186   :  { %647 = vmatprep.mubr.f32.mxu1 %v455_v49 }
 0x187   :  { %648 = vmatmul.mubr.f32.gmra.mxu1 %v456_v53 }
 0x241   :  { %v646_v28 = vpop.f32.mrf.mxu1 }
 0x242   :  { %v550_v62 = vadd.f32 %v646_v28, %v591_v17 }
 0x243   :  { %v544_v21 = vpop.f32.mrf.mxu1 }
 0x244   :  { %v564_v57 = vadd.f32 %v550_v62, %v161_v54  ;;  %v545_v22 = vadd.f32 %v591_v17, %v544_v21 }
 0x246   :  { %568 = vst [vmem:[%s1059_s5 + $0x8] sm:$0xff] %v564_v57  ;;  %v563_v59 = vadd.f32 %v545_v22, %v160_v56 }
 0x247   :  { %v649_v60 = vpop.f32.mrf.mxu1 }
 0x248   :  { %567 = vst [vmem:[%s1059_s5] sm:$0xff] %v563_v59  ;;  %v560_v36 = vadd.f32 %v649_v60, %v591_v17 }
 0x249   :  { %v554_v30 = vpop.f32.mrf.mxu1 }
 0x24a   :  { %v566_v0 = vadd.f32 %v560_v36, %v163_v63  ;;  %v555_v25 = vadd.f32 %v591_v17, %v554_v30 }
 0x24c   :  { %570 = vst [vmem:[%s1059_s5 + $0x18] sm:$0xff] %v566_v0  ;;  %v565_v47 = vadd.f32 %v555_v25, %v162_v45 }
 0x24e   :  { %569 = vst [vmem:[%s1059_s5 + $0x10] sm:$0xff] %v565_v47 }

</bundles_post_ra>
